<compile_context>
chip_gen: v5e
topology: v5e:2x2
jax: 0.10.0
libtpu: 0.0.40
codegen_flags: <defaults>
</compile_context>

<pallas_src>
import numpy as np
import jax
import jax.numpy as jnp
from jax.experimental import pallas as pl
from jax.experimental.pallas import tpu as pltpu

# ---- tile sizes -------------------------------------------------------------
_TC = 256                       # sorted contribution rows per tile (mask lanes / scatter K)
_FILL_UNIQ = -2                 # sentinel for padded unique rows (real linear indices >= 0)
_VMEM_LIMIT = 32 * 1024 * 1024  # explicit scoped-VMEM cap (plenty of headroom on all gens)


def _default_tu():
    """Unique-output rows per scatter tile: 256 fills the v6e/v7x 256x256 MXU,
    128 matches the 128x128 MXU on v5e and older."""
    try:
        kind = jax.devices()[0].device_kind.lower()
    except Exception:
        return 256
    if any(t in kind for t in ("v2", "v3", "v4", "v5")):
        return 128
    return 256


_TU = _default_tu()


def _round_up(x, m):
    return (x + m - 1) // m * m


def _pick_rc_tile(rf, cout_p, max_cols=2048):
    """Largest divisor d of rf such that d*cout_p <= max_cols (at least 1).
    With max_cols=2048 the whole W_wide usually stays resident (single j block)."""
    best = 1
    for d in range(1, rf + 1):
        if rf % d == 0 and d * cout_p <= max_cols:
            best = d
    return best * cout_p


# ---------------------------------------------------------------------------
# Kernel 1: fused dense matmul  nv = vals @ W_wide   (all rf taps in one dot)
# ---------------------------------------------------------------------------
def _dense_matmul_kernel(x_ref, w_ref, o_ref):
    o_ref[...] = jnp.dot(x_ref[...], w_ref[...],
                         preferred_element_type=jnp.float32).astype(o_ref.dtype)


def _dense_matmul(x_p, w_p, tn, trc):
    n_pad, cin_p = x_p.shape
    rc_pad = w_p.shape[1]
    return pl.pallas_call(
        _dense_matmul_kernel,
        out_shape=jax.ShapeDtypeStruct((n_pad, rc_pad), x_p.dtype),
        grid=(n_pad // tn, rc_pad // trc),
        in_specs=[
            pl.BlockSpec((tn, cin_p), lambda i, j: (i, 0)),
            pl.BlockSpec((cin_p, trc), lambda i, j: (0, j)),   # usually a single block
        ],
        out_specs=pl.BlockSpec((tn, trc), lambda i, j: (i, j)),
        compiler_params=pltpu.CompilerParams(
            dimension_semantics=("parallel", "parallel"),
            vmem_limit_bytes=_VMEM_LIMIT),
    )(x_p, w_p)


# ---------------------------------------------------------------------------
# Kernel 2: coalesce scatter-add as a band-restricted one-hot mask matmul
# ---------------------------------------------------------------------------
def _scatter_kernel(lo_ref, hi_ref, uniq_ref, lin_ref, contrib_ref, bias_ref,
                    y_ref):
    u = pl.program_id(0)
    c = pl.program_id(1)           # band-local contribution-tile index: 0 .. B_max-1

    @pl.when(c == 0)
    def _():
        # output block is resident across c -> initialize with the bias directly
        y_ref[...] = jnp.zeros_like(y_ref) + bias_ref[...]

    # only accumulate for steps inside this U-tile's live band (hi-lo < 0 => empty band)
    @pl.when(c <= hi_ref[u] - lo_ref[u])
    def _():
        # one-hot coalesce mask (TU, TC): generated once per step, fed straight to the MXU
        mask = (uniq_ref[...] == lin_ref[...]).astype(contrib_ref.dtype)
        y_ref[...] += jnp.dot(mask, contrib_ref[...],
                              preferred_element_type=jnp.float32)


def _coalesce_scatter(lo, hi, uniq_p, lin_p, contrib_p, bias_p, b_max):
    u_pad = uniq_p.shape[0]
    c_pad = lin_p.shape[1]
    cout_p = contrib_p.shape[1]
    num_u = u_pad // _TU
    num_c = c_pad // _TC

    def band_block(u, c, lo_ref, hi_ref):
        # clamp the band-local step into [lo, hi]; repeated block indices on the tail
        # steps mean no extra DMA for skipped iterations.
        l = lo_ref[u]
        h = hi_ref[u]
        off = jnp.minimum(c, jnp.maximum(h - l, 0))
        return jnp.clip(l + off, 0, num_c - 1)

    grid_spec = pltpu.PrefetchScalarGridSpec(
        num_scalar_prefetch=2,                       # lo / hi as 1-D SMEM arrays
        grid=(num_u, b_max),
        in_specs=[
            pl.BlockSpec((_TU, 1), lambda u, c, lo, hi: (u, 0)),                      # uniq
            pl.BlockSpec((1, _TC),
                         lambda u, c, lo, hi: (0, band_block(u, c, lo, hi))),         # lin
            pl.BlockSpec((_TC, cout_p),
                         lambda u, c, lo, hi: (band_block(u, c, lo, hi), 0)),         # contrib
            pl.BlockSpec((1, cout_p), lambda u, c, lo, hi: (0, 0)),                   # bias
        ],
        out_specs=pl.BlockSpec((_TU, cout_p), lambda u, c, lo, hi: (u, 0)),
    )
    return pl.pallas_call(
        _scatter_kernel,
        out_shape=jax.ShapeDtypeStruct((u_pad, cout_p), jnp.float32),
        grid_spec=grid_spec,
        compiler_params=pltpu.CompilerParams(
            dimension_semantics=("parallel", "arbitrary"),
            vmem_limit_bytes=_VMEM_LIMIT),
    )(lo, hi, uniq_p, lin_p, contrib_p, bias_p)


# ---------------------------------------------------------------------------
# Host-side glue (mirrors the PyTorch module)
# ---------------------------------------------------------------------------
def make_offsets(kernel_size, nd):
    """Replica of the module's `offsets` buffer: (rf, 1+nd), first column 0."""
    rf = kernel_size ** nd
    k = jnp.arange(kernel_size, dtype=jnp.int32)
    grids = jnp.meshgrid(*([k] * nd), indexing="ij")
    xyv = jnp.stack(grids).reshape(nd, -1).T.astype(jnp.int32)
    return jnp.concatenate([jnp.zeros((rf, 1), jnp.int32), xyv], axis=1)


def prepare_params(weights, bias, cin, cout, rf, compute_dtype=jnp.float32):
    """One-time parameter packing (hoisted out of the per-call forward).

    W_wide is (cin_p, rf*cout_p) so all rf taps run in one wide MXU dot and
    nv[:, r*cout_p:(r+1)*cout_p] is tap r, already lane-dense in cout."""
    cdt = jnp.dtype(compute_dtype)
    # bf16 packs two rows per sublane -> pad K to 16 there; f32 only needs 8.
    row_mult = 16 if cdt == jnp.dtype(jnp.bfloat16) else 8
    cin_p = _round_up(cin, row_mult)
    cout_p = _round_up(cout, 128)   # lane-dense output columns (unmasked stores, full MXU tile)
    w3 = weights.astype(jnp.float32).reshape(cin, rf, cout)
    w_wide = jnp.zeros((cin_p, rf, cout_p), jnp.float32)
    w_wide = w_wide.at[:cin, :, :cout].set(w3)
    w_wide = w_wide.reshape(cin_p, rf * cout_p).astype(cdt)
    bias_p = jnp.zeros((1, cout_p), jnp.float32).at[0, :cout].set(
        bias.astype(jnp.float32))
    return dict(w_wide=w_wide, bias=bias_p, cin=cin, cout=cout, rf=rf,
                cin_p=cin_p, cout_p=cout_p, compute_dtype=cdt)


def sparse_convnd_forward(pts, vals, size, params, kernel_size, stride=2, nd=2,
                          depthwise=False):
    """Forward of SparseConvNd.  Returns (out_pts, y, size)."""
    # TODO(synk): the depthwise branch of the reference (`values * weights` with shapes
    # (N,cin)*(cin,rf)) only broadcasts when N==cin; not implemented here.
    assert not depthwise
    N, ncols = pts.shape
    rf = params["rf"]
    cin, cout = params["cin"], params["cout"]
    cin_p, cout_p = params["cin_p"], params["cout_p"]
    cdt = params["compute_dtype"]

    offsets = make_offsets(kernel_size, nd)                               # (rf, 1+nd)

    # expanded points + "average pooling" shift of the spatial coordinates
    new_pts = pts[:, None, :].astype(jnp.int32) + offsets[None, :, :]     # (N, rf, 1+nd)
    new_pts = new_pts.at[:, :, 1:].set(new_pts[:, :, 1:] >> (stride - 1))
    new_pts = new_pts.reshape(N * rf, ncols)

    # linear index (same mixed-radix order as coalesce())
    # TODO(synk): int32 overflows silently for very large batch*spatial grids; a
    # per-batch split (or x64 int64) would be needed there.
    linear = jnp.zeros((N * rf,), jnp.int32)
    for i in range(ncols):
        linear = linear * jnp.int32(size[i]) + new_pts[:, i]

    # sorted unique output coordinates (data-dependent count -> host-side glue)
    # TODO(synk): jnp.unique(..., size=N*rf) + an on-device valid count would keep the
    # forward jittable; kept host-side because U and the band width shape the Pallas grid.
    uniq = jnp.unique(linear)
    U = int(uniq.shape[0])

    # decode unique linear indices back to (batch, y, x)
    out_cols = []
    rem = uniq
    for i in range(ncols - 1, -1, -1):
        out_cols.append(rem % jnp.int32(size[i]))
        rem = rem // jnp.int32(size[i])
    out_pts = jnp.stack(out_cols[::-1], axis=1)                           # (U, 1+nd)

    # ---- stage 1: one wide MXU matmul for all rf taps -----------------------
    tn = min(512, _round_up(N, 16))
    n_pad = _round_up(N, tn)
    trc = _pick_rc_tile(rf, cout_p)
    vals_p = jnp.zeros((n_pad, cin_p), cdt).at[:N, :cin].set(vals.astype(cdt))
    nv_wide = _dense_matmul(vals_p, params["w_wide"], tn, trc)            # (n_pad, rf*cout_p) cdt

    # contributions (row n*rf + r), already cout-padded and in the compute dtype
    contrib = nv_wide[:N].reshape(N * rf, cout_p)

    # sort contributions by linear index (plain-JAX argsort)
    order = jnp.argsort(linear).astype(jnp.int32)
    lin_sorted = linear[order]

    # ---- stage 2: band-restricted one-hot scatter-add on the MXU ------------
    C = N * rf
    c_pad = _round_up(C, _TC)
    # bucket U_pad to power-of-two multiples of _TU to limit recompilations
    u_pad = _TU * int(pl.next_power_of_2(int(pl.cdiv(U, _TU))))
    num_u = u_pad // _TU
    num_c = c_pad // _TC

    int_max = jnp.iinfo(jnp.int32).max
    # fused gather + zero-pad: OOB index C -> fill rows of zeros (no separate pad copy)
    order_p = jnp.full((c_pad,), C, jnp.int32).at[:C].set(order)
    contrib_p = jnp.take(contrib, order_p, axis=0, mode="fill", fill_value=0)
    lin_p = jnp.full((1, c_pad), int_max, jnp.int32).at[0, :C].set(lin_sorted)
    uniq_p = jnp.full((u_pad, 1), _FILL_UNIQ, jnp.int32).at[:U, 0].set(
        uniq.astype(jnp.int32))

    # per-U-tile live contribution-tile band [lo, hi] (two 1-D int32 arrays -> SMEM)
    tile_vals = uniq_p[:, 0].reshape(num_u, _TU)
    tmin = jnp.where(tile_vals == _FILL_UNIQ, int_max, tile_vals).min(axis=1)
    tmax = tile_vals.max(axis=1)          # -2 for all-padding tiles -> empty band
    c_first = jnp.searchsorted(lin_sorted, tmin, side="left").astype(jnp.int32)
    c_last = jnp.searchsorted(lin_sorted, tmax, side="right").astype(jnp.int32) - 1
    lo = (c_first // _TC).astype(jnp.int32)
    hi = (c_last // _TC).astype(jnp.int32)           # -1 for empty bands
    band_len = jnp.maximum(hi - lo + 1, 0)
    # inner grid extent = max band width, bucketed to a power of two (capped at num_c)
    b_max = max(1, min(int(pl.next_power_of_2(max(1, int(jnp.max(band_len))))), num_c))

    y_p = _coalesce_scatter(lo, hi, uniq_p, lin_p, contrib_p, params["bias"], b_max)
    y = y_p[:U, :cout]
    return out_pts, y, size


if __name__ == "__main__":
    key = jax.random.PRNGKey(0)
    kb, ky, kx, kv, kw, kbias = jax.random.split(key, 6)

    # small, module-consistent shapes
    B, H, W = 2, 16, 16
    cin, cout, kernel_size, nd, stride = 4, 8, 3, 2, 2
    N = 16
    rf = kernel_size ** nd
    size = (B, 9, 9)      # output grid ((coord + offset) >> 1 lies in [0, 8])

    b = jax.random.randint(kb, (N, 1), 0, B, dtype=jnp.int32)
    yy = jax.random.randint(ky, (N, 1), 0, H, dtype=jnp.int32)
    xx = jax.random.randint(kx, (N, 1), 0, W, dtype=jnp.int32)
    pts = jnp.concatenate([b, yy, xx], axis=1)                  # (N, 3)
    vals = jax.random.normal(kv, (N, cin), jnp.float32)         # (N, cin)

    # deterministic parameters (same shapes as the PyTorch module __init__)
    weights = jax.random.normal(kw, (cin, cout * rf), jnp.float32)
    bias = jax.random.normal(kbias, (cout,), jnp.float32)

    # ---- pure-JAX reference (mirrors the PyTorch semantics) ----
    offsets = make_offsets(kernel_size, nd)
    nv = vals @ weights
    nv2 = nv.reshape(N * rf, cout)
    np_pts = pts[:, None, :] + offsets[None, :, :]
    np_pts = np_pts.at[:, :, 1:].set(np_pts[:, :, 1:] >> (stride - 1))
    np_pts = np_pts.reshape(N * rf, nd + 1)
    lin = jnp.zeros((N * rf,), jnp.int32)
    for i in range(nd + 1):
        lin = lin * jnp.int32(size[i]) + np_pts[:, i]
    uniq_ref = jnp.unique(lin)
    dense_ref = jnp.zeros((int(np.prod(size)), cout), jnp.float32).at[lin].add(nv2)
    y_ref = dense_ref[uniq_ref] + bias

    # ---- f32 path (tight match against the reference) ----
    params_f32 = prepare_params(weights, bias, cin, cout, rf,
                                compute_dtype=jnp.float32)
    out_pts, y, out_size = sparse_convnd_forward(
        pts, vals, size, params_f32, kernel_size, stride, nd)
    jax.block_until_ready(y)
    assert y.shape == y_ref.shape, (y.shape, y_ref.shape)
    assert out_pts.shape == (y_ref.shape[0], nd + 1)
    np.testing.assert_allclose(np.asarray(y), np.asarray(y_ref),
                               rtol=1e-5, atol=1e-5)

    # ---- bf16 fast path for the MXU dots (f32 accumulation; looser tolerance) ----
    params_bf16 = prepare_params(weights, bias, cin, cout, rf,
                                 compute_dtype=jnp.bfloat16)
    _, y_bf16, _ = sparse_convnd_forward(
        pts, vals, size, params_bf16, kernel_size, stride, nd)
    jax.block_until_ready(y_bf16)
    np.testing.assert_allclose(np.asarray(y_bf16), np.asarray(y_ref),
                               rtol=1e-1, atol=1e-1)

    print("KERNEL_OK")
</pallas_src>

<mosaic_0001>
module attributes {stable_mosaic.version = 11 : i64} {
  func.func @_dense_matmul_kernel(%arg0: i32, %arg1: i32, %arg2: memref<16x8xf32, #tpu.memory_space<vmem>>, %arg3: memref<8x1152xf32, #tpu.memory_space<vmem>>, %arg4: memref<16x1152xf32, #tpu.memory_space<vmem>>) attributes {dimension_semantics = [#tpu.dimension_semantics<parallel>, #tpu.dimension_semantics<parallel>], iteration_bounds = array<i64: 1, 1>, scalar_prefetch = 0 : i64, scratch_operands = 0 : i64, tpu.core_type = #tpu.core_type<tc>, window_params = [{transform_indices = @transform_0, window_bounds = array<i64: 16, 8>}, {transform_indices = @transform_1, window_bounds = array<i64: 8, 1152>}, {transform_indices = @transform_2, window_bounds = array<i64: 16, 1152>}]} {
    %c0 = arith.constant 0 : index
    %c0_0 = arith.constant 0 : index
    %0 = vector.load %arg2[%c0, %c0_0] : memref<16x8xf32, #tpu.memory_space<vmem>>, vector<16x8xf32>
    %c0_1 = arith.constant 0 : index
    %c0_2 = arith.constant 0 : index
    %1 = vector.load %arg3[%c0_1, %c0_2] : memref<8x1152xf32, #tpu.memory_space<vmem>>, vector<8x1152xf32>
    %cst = arith.constant dense<0.000000e+00> : vector<16x1152xf32>
    %2 = tpu.matmul %0, %1, %cst {dimension_numbers = #tpu.dot_dimension_numbers<[1], [0], [0], [1], [0, 0, 1, 1], [], []>} : vector<16x8xf32>, vector<8x1152xf32>, vector<16x1152xf32> -> vector<16x1152xf32>
    %c0_3 = arith.constant 0 : index
    %c0_4 = arith.constant 0 : index
    %3 = vector.load %arg4[%c0_3, %c0_4] : memref<16x1152xf32, #tpu.memory_space<vmem>>, vector<16x1152xf32>
    tpu.vector_store %arg4[%c0_3, %c0_4], %2 {strides = array<i32>} : memref<16x1152xf32, #tpu.memory_space<vmem>>, vector<16x1152xf32>,
    return
  }
  func.func @transform_0(%arg0: i32, %arg1: i32) -> (i32, i32) {
    %c0_i32 = arith.constant 0 : i32
    %c0_i32_0 = arith.constant 0 : i32
    return %arg0, %c0_i32 : i32, i32
  }
  func.func @transform_1(%arg0: i32, %arg1: i32) -> (i32, i32) {
    %c0_i32 = arith.constant 0 : i32
    %c0_i32_0 = arith.constant 0 : i32
    return %c0_i32, %arg1 : i32, i32
  }
  func.func @transform_2(%arg0: i32, %arg1: i32) -> (i32, i32) {
    %c0_i32 = arith.constant 0 : i32
    return %arg0, %arg1 : i32, i32
  }
}

</mosaic_0001>

<bundles_post_ra>
// kernel: tpu_custom_call.1
= control target key start
LH: loop header
LB: loop body
LE: loop exit
PB: predicated region body
PF: predicated region fallthrough
CT: control target
= control target key end

     0   :  { %7 = vsyncpa [#allocation3], 0  ;;  %s412_s0 = inlined_call_operand.vmem [shape: f32[16,8], index: 0, kind: input, shape index: {}]   ;;  %s413_s1 = inlined_call_operand.hbm [shape: f32[8,1152], index: 1, kind: input, shape index: {}]   ;;  %s414_s2 = inlined_call_operand.hbm [shape: f32[16,1152], index: 2, kind: output, shape index: {}]  }
   0x1   :  { %8 = vsyncpa [#allocation4], 0  ;;  %s16_s11 = sshll.u32 %s413_s1, 4  ;;  %s363_s12 = smov [#allocation2]   ;;  %s17_s11 = int_to_ptr.hbm [resolvable:$true] %s16_s11 }
   0x2   :  { %s18_s13 = sshll.u32 %s363_s12, 4  ;;  %s19_s13 = int_to_ptr.vmem [resolvable:$true] %s18_s13 }
   0x3   :  { %21 = dma.hbm_to_vmem [thread:$0]  %s17_s11, 1152, %s19_s13, [#allocation3]  }
   0x4   :  { %359 = dma.done.wait [#allocation3], 1152  }
   0x5   :  { %360 = vsyncadd [#allocation3], 4294966144  ;;  %vm37_vm0 = vcmask 64512   ;;  %v28_v0 = vld [vmem:[#allocation2] sm:$0xff]  ;;  %v27_v2 = vld [vmem:[%s412_s0 + $0x8] sm:$0xff]  ;;  %s275_s20 = sshll.u32 %s414_s2, 4  ;;  %s276_s20 = int_to_ptr.hbm [resolvable:$true] %s275_s20 }
   0x6   :  { %v26_v1 = vld [vmem:[%s412_s0] sm:$0xff]  ;;  %59 = vmatpush.msra.mxu0 %v28_v0  ;;  %306 = vmatpush.msra.mxu1 %v28_v0  ;;  %v29_v3 = vld [vmem:[#allocation2 + $0x8] sm:$0xff]  ;;  %v30_v5 = vld [vmem:[#allocation2 + $0x10] sm:$0xff]  ;;  %s364_s0 = smov [#allocation5]   ;;  %s365_s21 = smov 1152  }
   0x7   :  { %v32_v4 = vld [vmem:[#allocation2 + $0x20] sm:$0xff]  ;;  %288 = vmatmul.msk.f32.vlgmr.msra.gmra.mxu0 %vm37_vm0, %v26_v1  ;;  %289 = vmatmul.msk.f32.vlgmr.msra.gmra.mxu1 %vm37_vm0, %v27_v2  ;;  %v31_v6 = vld [vmem:[#allocation2 + $0x18] sm:$0xff]  ;;  %v34_v7 = vld [vmem:[#allocation2 + $0x30] sm:$0xff]  ;;  %s273_s1 = sshll.u32 %s364_s0, 4  ;;  %s366_s22 = smov 72   ;;  %s274_s1 = int_to_ptr.vmem [resolvable:$true] %s273_s1 }
   0x8   :  { %82 = vmatpush.msrb.mxu1 %v29_v3  ;;  %151 = vmatpush.msrb.mxu0 %v32_v4  ;;  %v35_v8 = vld [vmem:[#allocation2 + $0x38] sm:$0xff]  ;;  %v33_v9 = vld [vmem:[#allocation2 + $0x28] sm:$0xff]  ;;  %v36_v10 = vld [vmem:[#allocation2 + $0x40] sm:$0xff] }
   0x9   :  { %105 = vmatpush.msra.mxu2 %v30_v5  ;;  %128 = vmatpush.msra.mxu3 %v31_v6 }
   0xa   :  { %292 = vmatmul.msk.f32.vlgmr.msra.gmra.mxu2 %vm37_vm0, %v26_v1  ;;  %294 = vmatmul.msk.f32.vlgmr.msra.gmra.mxu3 %vm37_vm0, %v26_v1 }
   0xb   :  { %197 = vmatpush.msrb.mxu2 %v34_v7  ;;  %220 = vmatpush.msrb.mxu3 %v35_v8 }
   0xc   :  { %174 = vmatpush.msra.mxu1 %v33_v9  ;;  %243 = vmatpush.msra.mxu0 %v36_v10 }
   0xf   :  { %290 = vmatmul.msk.f32.vlgmr.msrb.gmra.mxu1 %vm37_vm0, %v26_v1  ;;  %296 = vmatmul.msk.f32.vlgmr.msrb.gmra.mxu0 %vm37_vm0, %v26_v1 }
  0x12   :  { %293 = vmatmul.msk.f32.gmra.mxu2 %vm37_vm0, %v27_v2  ;;  %295 = vmatmul.msk.f32.gmra.mxu3 %vm37_vm0, %v27_v2 }
  0x17   :  { %291 = vmatmul.msk.f32.gmra.mxu1 %vm37_vm0, %v27_v2  ;;  %297 = vmatmul.msk.f32.gmra.mxu0 %vm37_vm0, %v27_v2 }
  0x1a   :  { %300 = vmatmul.msk.f32.vlgmr.msrb.gmra.mxu2 %vm37_vm0, %v26_v1  ;;  %302 = vmatmul.msk.f32.vlgmr.msrb.gmra.mxu3 %vm37_vm0, %v26_v1 }
  0x1f   :  { %298 = vmatmul.msk.f32.vlgmr.msra.gmra.mxu1 %vm37_vm0, %v26_v1  ;;  %304 = vmatmul.msk.f32.vlgmr.msra.gmra.mxu0 %vm37_vm0, %v26_v1 }
  0x22   :  { %301 = vmatmul.msk.f32.gmra.mxu2 %vm37_vm0, %v27_v2  ;;  %303 = vmatmul.msk.f32.gmra.mxu3 %vm37_vm0, %v27_v2 }
  0x27   :  { %299 = vmatmul.msk.f32.gmra.mxu1 %vm37_vm0, %v27_v2  ;;  %305 = vmatmul.msk.f32.gmra.mxu0 %vm37_vm0, %v27_v2 }
  0x84   :  { %v61_v11 = vpop.f32.mrf.mxu0  ;;  %v64_v12 = vpop.f32.mrf.mxu1 }
  0x85   :  { %251 = vst [vmem:[#allocation5] sm:$0xff] %v61_v11 }
  0x86   :  { %260 = vst [vmem:[#allocation5 + $0x48] sm:$0xff] %v64_v12 }
  0x8c   :  { %v84_v13 = vpop.f32.mrf.mxu1  ;;  %v153_v14 = vpop.f32.mrf.mxu0 }
  0x8d   :  { %252 = vst [vmem:[#allocation5 + $0x8] sm:$0xff] %v84_v13  ;;  %v107_v15 = vpop.f32.mrf.mxu2  ;;  %v130_v16 = vpop.f32.mrf.mxu3 }
  0x8e   :  { %253 = vst [vmem:[#allocation5 + $0x10] sm:$0xff] %v107_v15 }
  0x8f   :  { %254 = vst [vmem:[#allocation5 + $0x18] sm:$0xff] %v130_v16 }
  0x90   :  { %255 = vst [vmem:[#allocation5 + $0x20] sm:$0xff] %v153_v14 }
  0x94   :  { %v87_v17 = vpop.f32.mrf.mxu1  ;;  %v156_v18 = vpop.f32.mrf.mxu0 }
  0x95   :  { %261 = vst [vmem:[#allocation5 + $0x50] sm:$0xff] %v87_v17  ;;  %v110_v19 = vpop.f32.mrf.mxu2  ;;  %v133_v20 = vpop.f32.mrf.mxu3 }
  0x96   :  { %262 = vst [vmem:[#allocation5 + $0x58] sm:$0xff] %v110_v19 }
  0x97   :  { %263 = vst [vmem:[#allocation5 + $0x60] sm:$0xff] %v133_v20 }
  0x98   :  { %264 = vst [vmem:[#allocation5 + $0x68] sm:$0xff] %v156_v18 }
  0x9c   :  { %v176_v21 = vpop.f32.mrf.mxu1  ;;  %v245_v22 = vpop.f32.mrf.mxu0 }
  0x9d   :  { %256 = vst [vmem:[#allocation5 + $0x28] sm:$0xff] %v176_v21  ;;  %v199_v23 = vpop.f32.mrf.mxu2  ;;  %v222_v24 = vpop.f32.mrf.mxu3 }
  0x9e   :  { %257 = vst [vmem:[#allocation5 + $0x30] sm:$0xff] %v199_v23 }
  0x9f   :  { %258 = vst [vmem:[#allocation5 + $0x38] sm:$0xff] %v222_v24 }
  0xa0   :  { %259 = vst [vmem:[#allocation5 + $0x40] sm:$0xff] %v245_v22 }
  0xa4   :  { %v179_v25 = vpop.f32.mrf.mxu1  ;;  %v248_v26 = vpop.f32.mrf.mxu0 }
  0xa5   :  { %265 = vst [vmem:[#allocation5 + $0x70] sm:$0xff] %v179_v25  ;;  %v202_v27 = vpop.f32.mrf.mxu2  ;;  %v225_v28 = vpop.f32.mrf.mxu3 }
  0xa6   :  { %266 = vst [vmem:[#allocation5 + $0x78] sm:$0xff] %v202_v27 }
  0xa7   :  { %267 = vst [vmem:[#allocation5 + $0x80] sm:$0xff] %v225_v28 }
  0xa8   :  { %268 = vst [vmem:[#allocation5 + $0x88] sm:$0xff] %v248_v26 }
  0xa9   :  { %281 = dma.vmem_to_hbm [thread:$0]  %s274_s1, 2304, %s276_s20, [#allocation4], %s365_s21, %s365_s21, %s366_s22  }
  0xaa   :  { %361 = dma.done.wait [#allocation4], 2304  }
  0xab   :  { %362 = vsyncadd [#allocation4], 4294964992 }
  0xac   :  { %286 = vsyncpa [#allocation3], 1 }
  0xad   :  { %287 = vsyncpa [#allocation4], 1 }

</bundles_post_ra>
